<compile_context>
chip_gen: v5e
topology: v5e:2x2
jax: 0.10.0
libtpu: 0.0.40
codegen_flags: <defaults>
</compile_context>

<pallas_src>
import jax
import jax.numpy as jnp
from jax import lax
from jax.experimental import pallas as pl
from jax.experimental.pallas import tpu as pltpu


def _unimatch_kernel(x_ref, w1_ref, b1_ref, w2_ref, b2_ref, o_ref):
    """One (batch, spatial-block) tile, spatial-on-lanes layout.
       x_ref : (9*Cin, HW_BLK) bf16  im2col patches (contraction on sublanes)
       w1_ref: (Chid, 9*Cin)   bf16  fused 3x3 conv weight
       b1_ref: (Chid, 1)       f32
       w2_ref: (K, Chid)       f32   1x1 conv (classifier) weight
       b2_ref: (K, 1)          f32
       o_ref : (K, HW_BLK)     f32   sigmoid probabilities (lane-dense store)
    """
    # get_feats: fused 3x3 conv as ONE MXU matmul (bf16 ops, f32 acc), bias+ReLU.
    feat = jnp.dot(w1_ref[...], x_ref[...], preferred_element_type=jnp.float32)
    feat = jnp.maximum(feat + b1_ref[...], 0.0)

    # get_logits: tiny 1x1 conv classifier in f32 (<2% of FLOPs, no re-cast).
    logits = jnp.dot(w2_ref[...], feat,
                     preferred_element_type=jnp.float32) + b2_ref[...]

    # get_probs: sigmoid (EUP); store with HW on the 128-lane axis (unmasked vst).
    o_ref[...] = jax.nn.sigmoid(logits).astype(o_ref.dtype)


def _pick_hw_block(hw, target=4096):
    """Largest multiple of 128 that divides hw and is <= target.

    target ~4096 keeps live VMEM (2x patches + f32 feat + 2x out + weights)
    comfortably under v7x's 64 MiB even at Chid=256; on v6e/v5e (128 MiB VMEM)
    a larger target (8192-16384) can be swept for fewer grid steps.
    """
    best = None
    b = 128
    while b <= min(hw, target):
        if hw % b == 0:
            best = b
        b += 128
    return best if best is not None else hw


@jax.jit
def unimatch_forward(image_nchw, w1, b1, w2, b2):
    """image_nchw: (N, Cin, H, W) float32  ->  probs (N, K, H, W) float32."""
    N, Cin, H, W = image_nchw.shape
    Chid = w1.shape[3]
    K = w2.shape[1]
    HW = H * W
    hw_blk = _pick_hw_block(HW)

    # ---- im2col built directly in NCHW order (no HBM transposes) ----
    # Channel-axis ordering after concat is (kh, kw, cin), matching
    # w1.reshape(9*Cin, Chid) for HWIO weights.
    x_pad = jnp.pad(image_nchw, ((0, 0), (0, 0), (1, 1), (1, 1)))
    taps = [x_pad[:, :, kh:kh + H, kw:kw + W]
            for kh in range(3) for kw in range(3)]
    patches = jnp.concatenate(taps, axis=1)          # (N, 9*Cin, H, W)
    patches = patches.reshape(N, 9 * Cin, HW)        # (N, 9*Cin, HW)

    # Weight reshapes matching the (kh, kw, cin) im2col ordering.
    w1m = w1.reshape(9 * Cin, Chid).T                # (Chid, 9*Cin)
    w2t = w2.T                                       # (K, Chid), kept f32
    b1c = b1.reshape(Chid, 1)
    b2c = b2.reshape(K, 1)

    # bf16 MXU operands for the big matmul (f32 accumulation in-kernel);
    # halves the dominant patches DMA traffic.
    patches = patches.astype(jnp.bfloat16)
    w1m = w1m.astype(jnp.bfloat16)

    # Advisory cost estimate: lets XLA overlap wrapper-side im2col/casts.
    flops = 2 * N * HW * (9 * Cin * Chid + Chid * K)
    bytes_accessed = (patches.size * 2 + w1m.size * 2 + b1c.size * 4
                      + w2t.size * 4 + b2c.size * 4 + N * K * HW * 4)
    cost = pl.CostEstimate(flops=flops,
                           transcendentals=N * HW * K,
                           bytes_accessed=bytes_accessed)

    prob_flat = pl.pallas_call(
        _unimatch_kernel,
        out_shape=jax.ShapeDtypeStruct((N, K, HW), jnp.float32),
        grid_spec=pltpu.PrefetchScalarGridSpec(
            num_scalar_prefetch=0,
            grid=(N, HW // hw_blk),
            in_specs=[
                # im2col patches: one (batch, spatial-block) tile per step.
                pl.BlockSpec((None, 9 * Cin, hw_blk), lambda n, s: (n, 0, s)),
                # Weights / biases: whole array, constant index -> resident.
                pl.BlockSpec((Chid, 9 * Cin), lambda n, s: (0, 0)),
                pl.BlockSpec((Chid, 1), lambda n, s: (0, 0)),
                pl.BlockSpec((K, Chid), lambda n, s: (0, 0)),
                pl.BlockSpec((K, 1), lambda n, s: (0, 0)),
            ],
            out_specs=pl.BlockSpec((None, K, hw_blk), lambda n, s: (n, 0, s)),
        ),
        compiler_params=pltpu.CompilerParams(
            dimension_semantics=("parallel", "parallel")),
        cost_estimate=cost,
    )(patches, w1m, b1c, w2t, b2c)

    # (N, K, HW) -> (N, K, H, W): already NCHW-ordered, no output transpose.
    return prob_flat.reshape(N, K, H, W)


def _reference_forward(image_nchw, w1, b1, w2, b2):
    """Pure-JAX f32 reference (lax.conv) for correctness checking."""
    x = jnp.transpose(image_nchw, (0, 2, 3, 1))  # NHWC
    feat = lax.conv_general_dilated(
        x, w1, window_strides=(1, 1), padding="SAME",
        dimension_numbers=("NHWC", "HWIO", "NHWC"))
    feat = jnp.maximum(feat + b1, 0.0)
    logits = jnp.einsum("nhwc,ck->nhwk", feat, w2) + b2
    prob = jax.nn.sigmoid(logits)
    return jnp.transpose(prob, (0, 3, 1, 2))


if __name__ == "__main__":
    # Small, deterministic synthetic setup.
    N, Cin, H, W = 2, 4, 16, 16        # image: NCHW
    Chid = 32                          # hidden feature channels
    num_classes = 4                    # args.num_classes

    key = jax.random.PRNGKey(0)
    k_img, k_w1, k_b1, k_w2, k_b2 = jax.random.split(key, 5)

    image = jax.random.normal(k_img, (N, Cin, H, W), dtype=jnp.float32)
    w1 = 0.1 * jax.random.normal(k_w1, (3, 3, Cin, Chid), dtype=jnp.float32)
    b1 = 0.1 * jax.random.normal(k_b1, (Chid,), dtype=jnp.float32)
    w2 = 0.1 * jax.random.normal(k_w2, (Chid, num_classes), dtype=jnp.float32)
    b2 = 0.1 * jax.random.normal(k_b2, (num_classes,), dtype=jnp.float32)

    prob = unimatch_forward(image, w1, b1, w2, b2)
    jax.block_until_ready(prob)

    ref = _reference_forward(image, w1, b1, w2, b2)
    assert prob.shape == (N, num_classes, H, W)
    # Only the first matmul uses bf16 operands (f32 accumulation, f32 classifier)
    # -> tighter tolerance than the previous revision.
    assert jnp.allclose(prob, ref, atol=1e-2, rtol=1e-3), "mismatch vs reference"

    # TODO(synk): training-time update() (AdamW, BCE loss, pseudo-labels, dropout
    # consistency) is outside the forward pass and not implemented here.
    print("KERNEL_OK")
</pallas_src>

<mosaic_0001>
module attributes {stable_mosaic.version = 11 : i64} {
  func.func @_unimatch_kernel(%arg0: i32, %arg1: i32, %arg2: memref<1x36x256xbf16, #tpu.memory_space<vmem>>, %arg3: memref<32x36xbf16, #tpu.memory_space<vmem>>, %arg4: memref<32x1xf32, #tpu.memory_space<vmem>>, %arg5: memref<4x32xf32, #tpu.memory_space<vmem>>, %arg6: memref<4x1xf32, #tpu.memory_space<vmem>>, %arg7: memref<1x4x256xf32, #tpu.memory_space<vmem>>) attributes {dimension_semantics = [#tpu.dimension_semantics<parallel>, #tpu.dimension_semantics<parallel>], iteration_bounds = array<i64: 2, 1>, scalar_prefetch = 0 : i64, scratch_operands = 0 : i64, tpu.core_type = #tpu.core_type<tc>, window_params = [{transform_indices = @transform_0, window_bounds = array<i64: 1, 36, 256>}, {pipeline_mode = #tpu.pipeline_mode<synchronous>, transform_indices = @transform_1, window_bounds = array<i64: 32, 36>}, {pipeline_mode = #tpu.pipeline_mode<synchronous>, transform_indices = @transform_2, window_bounds = array<i64: 32, 1>}, {pipeline_mode = #tpu.pipeline_mode<synchronous>, transform_indices = @transform_3, window_bounds = array<i64: 4, 32>}, {pipeline_mode = #tpu.pipeline_mode<synchronous>, transform_indices = @transform_4, window_bounds = array<i64: 4, 1>}, {transform_indices = @transform_5, window_bounds = array<i64: 1, 4, 256>}]} {
    %c0 = arith.constant 0 : index
    %c0_0 = arith.constant 0 : index
    %0 = vector.load %arg3[%c0, %c0_0] : memref<32x36xbf16, #tpu.memory_space<vmem>>, vector<32x36xbf16>
    %c0_1 = arith.constant 0 : index
    %c0_2 = arith.constant 0 : index
    %c0_3 = arith.constant 0 : index
    %1 = vector.load %arg2[%c0_1, %c0_2, %c0_3] : memref<1x36x256xbf16, #tpu.memory_space<vmem>>, vector<1x36x256xbf16>
    %2 = vector.shape_cast %1 : vector<1x36x256xbf16> to vector<36x256xbf16>
    %cst = arith.constant dense<0.000000e+00> : vector<32x256xf32>
    %3 = tpu.matmul %0, %2, %cst {dimension_numbers = #tpu.dot_dimension_numbers<[1], [0], [0], [1], [0, 0, 1, 1], [], []>} : vector<32x36xbf16>, vector<36x256xbf16>, vector<32x256xf32> -> vector<32x256xf32>
    %c0_4 = arith.constant 0 : index
    %c0_5 = arith.constant 0 : index
    %4 = vector.load %arg4[%c0_4, %c0_5] : memref<32x1xf32, #tpu.memory_space<vmem>>, vector<32x1xf32>
    %5 = vector.broadcast %4 : vector<32x1xf32> to vector<32x256xf32>
    %6 = arith.addf %3, %5 : vector<32x256xf32>
    %cst_6 = arith.constant 0.000000e+00 : f32
    %7 = vector.broadcast %cst_6 : f32 to vector<32x256xf32>
    %8 = arith.maximumf %6, %7 : vector<32x256xf32>
    %c0_7 = arith.constant 0 : index
    %c0_8 = arith.constant 0 : index
    %9 = vector.load %arg5[%c0_7, %c0_8] : memref<4x32xf32, #tpu.memory_space<vmem>>, vector<4x32xf32>
    %cst_9 = arith.constant dense<0.000000e+00> : vector<4x256xf32>
    %10 = tpu.matmul %9, %8, %cst_9 {dimension_numbers = #tpu.dot_dimension_numbers<[1], [0], [0], [1], [0, 0, 1, 1], [], []>} : vector<4x32xf32>, vector<32x256xf32>, vector<4x256xf32> -> vector<4x256xf32>
    %c0_10 = arith.constant 0 : index
    %c0_11 = arith.constant 0 : index
    %11 = vector.load %arg6[%c0_10, %c0_11] : memref<4x1xf32, #tpu.memory_space<vmem>>, vector<4x1xf32>
    %12 = vector.broadcast %11 : vector<4x1xf32> to vector<4x256xf32>
    %13 = arith.addf %10, %12 : vector<4x256xf32>
    %14 = arith.negf %13 : vector<4x256xf32>
    %15 = math.exp %14 : vector<4x256xf32>
    %cst_12 = arith.constant 1.000000e+00 : f32
    %16 = vector.broadcast %cst_12 : f32 to vector<4x256xf32>
    %17 = arith.addf %16, %15 : vector<4x256xf32>
    %18 = arith.divf %16, %17 : vector<4x256xf32>
    %c0_13 = arith.constant 0 : index
    %c0_14 = arith.constant 0 : index
    %c0_15 = arith.constant 0 : index
    %19 = vector.load %arg7[%c0_13, %c0_14, %c0_15] : memref<1x4x256xf32, #tpu.memory_space<vmem>>, vector<1x4x256xf32>
    %20 = vector.shape_cast %19 : vector<1x4x256xf32> to vector<4x256xf32>
    %21 = vector.shape_cast %18 : vector<4x256xf32> to vector<1x4x256xf32>
    tpu.vector_store %arg7[%c0_13, %c0_14, %c0_15], %21 {strides = array<i32>} : memref<1x4x256xf32, #tpu.memory_space<vmem>>, vector<1x4x256xf32>,
    return
  }
  func.func @transform_0(%arg0: i32, %arg1: i32) -> (i32, i32, i32) {
    %c0_i32 = arith.constant 0 : i32
    %c0_i32_0 = arith.constant 0 : i32
    return %arg0, %c0_i32, %arg1 : i32, i32, i32
  }
  func.func @transform_1(%arg0: i32, %arg1: i32) -> (i32, i32) {
    %c0_i32 = arith.constant 0 : i32
    %c0_i32_0 = arith.constant 0 : i32
    %c0_i32_1 = arith.constant 0 : i32
    return %c0_i32, %c0_i32_0 : i32, i32
  }
  func.func @transform_2(%arg0: i32, %arg1: i32) -> (i32, i32) {
    %c0_i32 = arith.constant 0 : i32
    %c0_i32_0 = arith.constant 0 : i32
    %c0_i32_1 = arith.constant 0 : i32
    return %c0_i32, %c0_i32_0 : i32, i32
  }
  func.func @transform_3(%arg0: i32, %arg1: i32) -> (i32, i32) {
    %c0_i32 = arith.constant 0 : i32
    %c0_i32_0 = arith.constant 0 : i32
    %c0_i32_1 = arith.constant 0 : i32
    return %c0_i32, %c0_i32_0 : i32, i32
  }
  func.func @transform_4(%arg0: i32, %arg1: i32) -> (i32, i32) {
    %c0_i32 = arith.constant 0 : i32
    %c0_i32_0 = arith.constant 0 : i32
    %c0_i32_1 = arith.constant 0 : i32
    return %c0_i32, %c0_i32_0 : i32, i32
  }
  func.func @transform_5(%arg0: i32, %arg1: i32) -> (i32, i32, i32) {
    %c0_i32 = arith.constant 0 : i32
    %c0_i32_0 = arith.constant 0 : i32
    return %arg0, %c0_i32, %arg1 : i32, i32, i32
  }
}

</mosaic_0001>

<bundles_post_ra>
// kernel: unimatch_forward.1
= control target key start
LH: loop header
LB: loop body
LE: loop exit
PB: predicated region body
PF: predicated region fallthrough
CT: control target
= control target key end

     0   :  { %s723_s18 = smov 0   ;;  %s725_s19 = smov 0   ;;  %s790_s0 = inlined_call_operand.vmem [shape: bf16[2,36,256], index: 0, kind: input, shape index: {}]   ;;  %s791_s1 = inlined_call_operand.vmem [shape: bf16[32,36], index: 1, kind: input, shape index: {}]   ;;  %s792_s2 = inlined_call_operand.vmem [shape: f32[32,1], index: 2, kind: input, shape index: {}]   ;;  %s793_s3 = inlined_call_operand.vmem [shape: f32[4,32], index: 3, kind: input, shape index: {}]   ;;  %s794_s4 = inlined_call_operand.vmem [shape: f32[4,1], index: 4, kind: input, shape index: {}]   ;;  %s795_s5 = inlined_call_operand.vmem [shape: f32[2,4,256], index: 5, kind: output, shape index: {}]  }
   0x1   :  { %s727_s20 = smov 0  }
   0x2 LB: > { %s27_s21 = sadd.s32 1, %s686_s19  ;;  %p580_p0 = scmp.ge.s32.totalorder %s690_s20, 1  ;;  %s690_s20 = sphi %s727_s20, %s15_s20   ;;  %s686_s19 = sphi %s725_s19, %s799_s19   ;;  %s682_s18 = sphi %s723_s18, %s798_s18  }
   0x3   : > { %p29_p1 = scmp.ge.s32.totalorder %s27_s21, 2  ;;  %p208_p2 = scmp.lt.s32.totalorder %s690_s20, 3 }
   0x5   : > { %s801_s21 = smov (%p29_p1, %s27_s21), 0  ;;  %p209_p3 = pnand %p580_p0, %p208_p2 }
   0x6   : > { %p245_p4 = scmp.lt.s32.totalorder (!%p209_p3), %s682_s18, 1 }
   0x7   : > { %212 = sbr.rel (%p209_p3) target bundleno = 352 (0x160), region = 40 }
   0xc   : > { %v692_v0 = vmov 0   ;;  %v277_v1 = vld [vmem:[%s792_s2 + $0x18] sm:$0xff]  ;;  %v275_v2 = vld [vmem:[%s792_s2 + $0x8] sm:$0xff]  ;;  %s803_s18 = smov (!%p245_p4, %s682_s18), 1  ;;  %v276_v4 = vld [vmem:[%s792_s2 + $0x10] sm:$0xff]  ;;  %vm340_vm0 = vcmask 1041408  }
   0xd   : > { %657 = vset.pattern.permute.xlu0 %v692_v0  ;;  %658 = vset.pattern.permute.xlu1 %v692_v0  ;;  %s631_s26 = smul.u32 40, %s803_s18  ;;  %v274_v7 = vld [vmem:[%s792_s2] sm:$0xff]  ;;  %v620_v24 = vld [vmem:[%s791_s1 + $0x8] sm:$0xff]  ;;  %vm333_vm1 = vcmask 293888   ;;  %vm400_vm2 = vcmask 261120   ;;  %s618_s17 = sshll.u32 %s803_s18, 3 }
   0xe   : > { %295 = vperm.xlu0 %657, %v277_v1   ;;  %285 = vperm.xlu1 %658, %v275_v2   ;;  %v619_v25 = vld [vmem:[%s791_s1] sm:$0xff]  ;;  %vm485_vm10 = vcmask 1043456   ;;  %s262_s24 = scalar_lea.vmem %s795_s5, %s618_s17 }
   0xf   : > { %659 = vset.pattern.permute.xlu2 %v692_v0  ;;  %s252_s29 = scalar_lea.vmem %s790_s0, %s631_s26  ;;  %v394_v26 = vld [vmem:[%s794_s4] sm:$0xf] }
  0x10   : > { %v273_v3 = vld [vmem:[%s252_s29 + $0x20] sm:$0x33]  ;;  %v602_v8 = vld [vmem:[%s252_s29 + $0x10] sm:$0xf]  ;;  %v624_v11 = vld [vmem:[%s252_s29 + $0x14] sm:$0xf0]  ;;  %397 = vperm.xlu2 %659, %v394_v26  }
  0x11   : > { %v321_v5 = vunpack.c.l.b16 %v273_v3  ;;  %v322_v6 = vunpack.c.h.b16 %v273_v3  ;;  %v623_v12 = vld [vmem:[%s252_s29 + $0x14] sm:$0xf]  ;;  %v604_v13 = vld [vmem:[%s252_s29 + $0x18] sm:$0xf0]  ;;  %v603_v16 = vor.u32 %v624_v11, %v602_v8  ;;  %v594_v18 = vld [vmem:[%s252_s29] sm:$0xf] }
  0x12   : > { %v607_v17 = vor.u32 %v623_v12, %v604_v13  ;;  %v622_v19 = vld [vmem:[%s252_s29 + $0x4] sm:$0xf0]  ;;  %v621_v20 = vld [vmem:[%s252_s29 + $0x4] sm:$0xf]  ;;  %v596_v21 = vld [vmem:[%s252_s29 + $0x8] sm:$0xf0] }
  0x13   : > { %v327_v9 = vpack.c.b16 %v321_v5, %v321_v5  ;;  %v328_v10 = vpack.c.b16 %v322_v6, %v322_v6  ;;  %v595_v22 = vor.u32 %v622_v19, %v594_v18  ;;  %v599_v23 = vor.u32 %v621_v20, %v596_v21  ;;  %v393_v55 = vld [vmem:[%s793_s3] sm:$0xf] }
  0x15   : > { %v342_v14 = vsel %vm340_vm0, %v327_v9, 0  ;;  %v345_v15 = vsel %vm340_vm0, %v328_v10, 0 }
  0x16   : > { %290 = vperm.xlu0 %657, %v276_v4   ;;  %280 = vperm.xlu1 %658, %v274_v7  }
  0x17   : > { %625 = vmatpush.bf16.msra.mxu2 %v342_v14  ;;  %628 = vmatpush.bf16.msra.mxu3 %v345_v15 }
  0x18   : > { %371 = vmatpush.bf16.msra.mxu1 %v345_v15  ;;  %352 = vmatpush.bf16.msra.mxu0 %v342_v14 }
  0x1b   : > { %626 = vmatpush.bf16.msra.mxu2 %v603_v16  ;;  %629 = vmatpush.bf16.msra.mxu3 %v607_v17 }
  0x1c   : > { %372 = vmatpush.bf16.msra.mxu1 %v607_v17  ;;  %353 = vmatpush.bf16.msra.mxu0 %v603_v16 }
  0x1f   : > { %627 = vmatpush.bf16.msra.mxu2 %v595_v22  ;;  %630 = vmatpush.bf16.msra.mxu3 %v599_v23 }
  0x20   : > { %373 = vmatpush.bf16.msra.mxu1 %v599_v23  ;;  %354 = vmatpush.bf16.msra.mxu0 %v595_v22 }
  0x22   : > { %609 = vmatmul.msk.bf16.vlgmr.msra.gmra.mxu2 %vm333_vm1, %v620_v24  ;;  %611 = vmatmul.msk.bf16.vlgmr.msra.gmra.mxu3 %vm333_vm1, %v620_v24 }
  0x23   : > { %610 = vmatmul.msk.bf16.vlgmr.msra.gmra.mxu1 %vm333_vm1, %v619_v25  ;;  %608 = vmatmul.msk.bf16.vlgmr.msra.gmra.mxu0 %vm333_vm1, %v619_v25 }
  0x6a   : > { %v398_v56 = vpop.permute.xlu2 %397 }
  0x80   : > { %v296_v27 = vpop.permute.xlu0 %295  ;;  %v286_v30 = vpop.permute.xlu1 %285 }
  0x88   : > { %v291_v33 = vpop.permute.xlu0 %290  ;;  %v281_v42 = vpop.permute.xlu1 %280 }
  0xa0   : > { %v375_v28 = vpop.f32.mrf.mxu1  ;;  %v356_v29 = vpop.f32.mrf.mxu0 }
  0xa1   : > { %v357_v49 = vadd.f32 %v356_v29, %v281_v42  ;;  %v376_v50 = vadd.f32 %v375_v28, %v281_v42 }
  0xa3   : > { %v385_v53 = vmax.f32 %v357_v49, 0.0  ;;  %v386_v54 = vmax.f32 %v376_v50, 0.0 }
  0xa5   : > { %v361_v31 = vpop.f32.mrf.mxu2  ;;  %v380_v32 = vpop.f32.mrf.mxu3 }
  0xa6   : > { %v362_v38 = vadd.f32 %v361_v31, %v291_v33  ;;  %v381_v39 = vadd.f32 %v380_v32, %v291_v33 }
  0xa8   : > { %v377_v34 = vpop.f32.mrf.mxu1  ;;  %v358_v35 = vpop.f32.mrf.mxu0  ;;  %v389_v47 = vmax.f32 %v362_v38, 0.0  ;;  %v390_v48 = vmax.f32 %v381_v39, 0.0 }
  0xa9   : > { %v378_v44 = vadd.f32 %v377_v34, %v286_v30  ;;  %v359_v46 = vadd.f32 %v358_v35, %v286_v30 }
  0xab   : > { %v388_v51 = vmax.f32 %v378_v44, 0.0  ;;  %v387_v52 = vmax.f32 %v359_v46, 0.0 }
  0xad   : > { %v363_v36 = vpop.f32.mrf.mxu2  ;;  %v382_v37 = vpop.f32.mrf.mxu3 }
  0xae   : > { %v364_v40 = vadd.f32 %v363_v36, %v296_v27  ;;  %v383_v41 = vadd.f32 %v382_v37, %v296_v27 }
  0xb0   : > { %v391_v43 = vmax.f32 %v364_v40, 0.0  ;;  %v392_v45 = vmax.f32 %v383_v41, 0.0 }
  0xb2   : > { %416 = vmatpush.msrb.mxu2 %v391_v43  ;;  %436 = vmatpush.msrb.mxu3 %v392_v45 }
  0xb4   : > { %417 = vmatpush.msrb.mxu2 %v389_v47  ;;  %437 = vmatpush.msrb.mxu3 %v390_v48 }
  0xb6   : > { %418 = vmatpush.msrb.mxu2 %v387_v52  ;;  %438 = vmatpush.msrb.mxu3 %v388_v51 }
  0xb8   : > { %419 = vmatpush.msrb.mxu2 %v385_v53  ;;  %439 = vmatpush.msrb.mxu3 %v386_v54 }
  0xb9   : > { %612 = vmatmul.msk.f32.vlgmr.msrb.gmra.mxu2 %vm400_vm2, %v393_v55  ;;  %613 = vmatmul.msk.f32.vlgmr.msrb.gmra.mxu3 %vm400_vm2, %v393_v55 }
 0x13c   : > { %v421_v57 = vpop.f32.mrf.mxu2  ;;  %v441_v58 = vpop.f32.mrf.mxu3 }
 0x13d   : > { %v422_v59 = vadd.f32 %v421_v57, %v398_v56  ;;  %v442_v60 = vadd.f32 %v441_v58, %v398_v56 }
 0x13f   : > { %v614_v61 = vmul.f32 -1.442695, %v422_v59  ;;  %v615_v62 = vmul.f32 -1.442695, %v442_v60 }
 0x141   : > { %660 = vpow2.f32 %v614_v61 }
 0x142   : > { %662 = vpow2.f32 %v615_v62 }
 0x147   : > { %v661_v63 = vpop.eup %660 }
 0x148   : > { %v663_v0 = vpop.eup %662  ;;  %v450_v1 = vadd.f32 1.0, %v661_v63 }
 0x149   : > { %v451_v2 = vadd.f32 1.0, %v663_v0 }
 0x14a   : > { %664 = vrcp.f32 %v450_v1  ;;  %vm457_vm5 = vweird.f32 %v450_v1  ;;  %v463_v14 = vand.u32 2147483648, %v450_v1  ;;  %v461_v16 = vand.u32 2147483647, %v450_v1 }
 0x14b   : > { %666 = vrcp.f32 %v451_v2  ;;  %v478_v10 = vand.u32 2147483648, %v451_v2  ;;  %v476_v12 = vand.u32 2147483647, %v451_v2  ;;  %vm472_vm7 = vweird.f32 %v451_v2 }
 0x14c   : > { %v464_v21 = vor.u32 1.1754944e-38, %v463_v14  ;;  %vm462_vm11 = vcmp.eq.f32.partialorder %v461_v16, 8.507059e+37 }
 0x14d   : > { %v479_v18 = vor.u32 1.1754944e-38, %v478_v10  ;;  %vm477_vm9 = vcmp.eq.f32.partialorder %v476_v12, 8.507059e+37 }
 0x150   : > { %v665_v3 = vpop.eup %664 }
 0x151   : > { %v667_v4 = vpop.eup %666  ;;  %v453_v5 = vmul.f32 %v665_v3, %v450_v1  ;;  %vm458_vm3 = vweird.f32 %v665_v3 }
 0x152   : > { %v468_v6 = vmul.f32 %v667_v4, %v451_v2  ;;  %vm473_vm4 = vweird.f32 %v667_v4  ;;  %vm771_vm6 = vmor %vm457_vm5, %vm458_vm3 }
 0x153   : > { %v454_v7 = vsub.f32 1.0, %v453_v5  ;;  %vm474_vm8 = vmor %vm472_vm7, %vm473_vm4 }
 0x154   : > { %v469_v8 = vsub.f32 1.0, %v468_v6 }
 0x155   : > { %v455_v9 = vmul.f32 %v665_v3, %v454_v7 }
 0x156   : > { %v470_v11 = vmul.f32 %v667_v4, %v469_v8 }
 0x157   : > { %v456_v13 = vadd.f32 %v665_v3, %v455_v9 }
 0x158   : > { %v471_v17 = vadd.f32 %v667_v4, %v470_v11 }
 0x159   : > { %v460_v19 = vsel %vm771_vm6, %v665_v3, %v456_v13 }
 0x15a   : > { %v475_v20 = vsel %vm474_vm8, %v667_v4, %v471_v17  ;;  %v465_v24 = vsel %vm462_vm11, %v464_v21, %v460_v19 }
 0x15b   : > { %v480_v22 = vsel %vm477_vm9, %v479_v18, %v475_v20 }
 0x15c   : > { %v484_v23 = vrot.slane %v480_v22, 4 }
 0x15e   : > { %v486_v25 = vsel %vm485_vm10, %v465_v24, %v484_v23 }
 0x15f   : > { %488 = vst [vmem:[%s262_s24] sm:$0xff] %v486_v25 }
 0x160 PF: > { %s15_s20 = sadd.s32 1, %s690_s20   ;;  %s798_s18 = smov %s686_s19 }
 0x161   : > { %p12_p5 = scmp.ge.s32.totalorder %s15_s20, 4   ;;  %s799_s19 = smov %s801_s21 }
 0x163   :  { %14 = sbr.rel (!%p12_p5) target bundleno = 2 (0x2), region = 70 }

</bundles_post_ra>
